<compile_context>
chip_gen: v7x
topology: tpu7x:2x2x1
jax: 0.10.0
libtpu: 0.0.40
codegen_flags: <defaults>
</compile_context>

<pallas_src>
import functools

import jax
import jax.numpy as jnp
import numpy as np
from jax.experimental import pallas as pl
from jax.experimental.pallas import tpu as pltpu


def _f_conv_kernel(x_ref, m_ref, w1_ref, b1_ref, w2_ref, b2_ref,
                   w3_ref, b3_ref, o_ref, *, img_w, slope):
    """One image per grid step.

    x_ref: (Cin, HW) input, channel-major, HW on the lane axis.
    m_ref: (9, 1, HW) per-tap validity masks ("same" padding, roll-wrap kill).
    w*_ref: (Cout, 9*Cin) tap-major packed weights;  b*_ref: (Cout, 1).
    o_ref: (Cout, HW).
    """
    hw = x_ref.shape[-1]

    def conv3x3(h, w_ref, b_ref):
        cin = h.shape[0]
        # 9 lane-rolled, per-tap-masked copies of the activation.
        taps = []
        for ky in range(3):
            for kx in range(3):
                s = (ky - 1) * img_w + (kx - 1)          # flat tap offset
                t = h if s == 0 else pltpu.roll(h, (-s) % hw, axis=1)
                if not (ky == 1 and kx == 1):            # center mask is all-ones
                    t = t * m_ref[ky * 3 + kx]           # (1, HW) broadcast
                taps.append(t)

        if cin % 8 == 0:
            # Tap-folded path: one MXU matmul, K = 9*Cin (sublane-aligned stack).
            stacked = jnp.concatenate(taps, axis=0)      # (9*Cin, HW)
            acc = jnp.dot(w_ref[...], stacked,
                          preferred_element_type=jnp.float32)
        else:
            # Fallback (Cin not 8-aligned): accumulate 9 small dots.
            acc = jnp.zeros((w_ref.shape[0], hw), jnp.float32)
            for k in range(9):
                acc = acc + jnp.dot(w_ref[:, k * cin:(k + 1) * cin], taps[k],
                                    preferred_element_type=jnp.float32)
        return acc + b_ref[...]                          # (Cout, 1) broadcast

    h = x_ref[...].astype(jnp.float32)                   # (Cin, HW)
    h = conv3x3(h, w1_ref, b1_ref)
    h = jnp.where(h >= 0.0, h, slope * h)
    h = conv3x3(h, w2_ref, b2_ref)
    h = jnp.where(h >= 0.0, h, slope * h)
    h = conv3x3(h, w3_ref, b3_ref)                       # conv3: no activation
    o_ref[...] = h.astype(o_ref.dtype)


def _tap_masks(H, W):
    """(9, 1, H*W) {0,1} masks: tap k=ky*3+kx valid where (y+ky-1, x+kx-1) in-bounds."""
    ys, xs = np.meshgrid(np.arange(H), np.arange(W), indexing="ij")
    m = np.zeros((9, 1, H * W), np.float32)
    for ky in range(3):
        for kx in range(3):
            vy = (ys + ky - 1 >= 0) & (ys + ky - 1 < H)
            vx = (xs + kx - 1 >= 0) & (xs + kx - 1 < W)
            m[ky * 3 + kx, 0] = (vy & vx).astype(np.float32).reshape(-1)
    return jnp.asarray(m)


def _pack_weight(w):
    """(Cout, Cin, kH, kW) PyTorch layout -> (Cout, kH*kW*Cin), tap-major columns."""
    co, ci, kh, kw = w.shape
    return jnp.transpose(w, (0, 2, 3, 1)).reshape(co, kh * kw * ci)


def f_conv_pallas(x_nchw, params, *, leaky_slope=0.1):
    """x_nchw: [B, Cin, H, W]; params: PyTorch-layout conv weights/biases."""
    B, cin, H, W = x_nchw.shape
    hw = H * W
    chid = params["w1"].shape[0]
    cout = params["w3"].shape[0]

    # Tiny one-time packing of parameters (tap-major columns, column biases).
    w1 = _pack_weight(params["w1"]); b1 = params["b1"].reshape(chid, 1)
    w2 = _pack_weight(params["w2"]); b2 = params["b2"].reshape(chid, 1)
    w3 = _pack_weight(params["w3"]); b3 = params["b3"].reshape(cout, 1)
    masks = _tap_masks(H, W)

    # Free reshape — no transpose, no padding, no canvas.
    x_flat = x_nchw.reshape(B, cin, hw)

    def const_spec(shape):
        nd = len(shape)
        return pl.BlockSpec(shape, lambda i, _nd=nd: (0,) * _nd)

    flops = 2 * B * hw * 9 * (cin * chid + chid * chid + chid * cout)
    bytes_accessed = 4 * (x_flat.size + masks.size + B * cout * hw
                          + w1.size + w2.size + w3.size
                          + b1.size + b2.size + b3.size)

    kernel = functools.partial(_f_conv_kernel, img_w=W, slope=leaky_slope)
    out_flat = pl.pallas_call(
        kernel,
        out_shape=jax.ShapeDtypeStruct((B, cout, hw), x_nchw.dtype),
        grid_spec=pltpu.PrefetchScalarGridSpec(
            num_scalar_prefetch=0,
            grid=(B,),                                   # >= 2 parallel steps at B >= 2
            in_specs=[
                pl.BlockSpec((None, cin, hw), lambda i: (i, 0, 0)),
                const_spec(masks.shape),
                const_spec(w1.shape), const_spec(b1.shape),
                const_spec(w2.shape), const_spec(b2.shape),
                const_spec(w3.shape), const_spec(b3.shape),
            ],
            out_specs=pl.BlockSpec((None, cout, hw), lambda i: (i, 0, 0)),
        ),
        compiler_params=pltpu.CompilerParams(
            dimension_semantics=("parallel",)),
        cost_estimate=pl.CostEstimate(flops=int(flops), transcendentals=0,
                                      bytes_accessed=int(bytes_accessed)),
    )(x_flat, masks, w1, b1, w2, b2, w3, b3)

    return out_flat.reshape(B, cout, H, W)               # free reshape back to NCHW


def init_params(key, in_channels, channels, channels_hidden=None, kernel_size=3):
    """Deterministic PyTorch-Conv2d-style uniform init, PyTorch (O,I,kH,kW) layout."""
    if not channels_hidden:
        channels_hidden = channels

    def conv_layer(k, cin, cout):
        kw_, kb = jax.random.split(k)
        fan_in = cin * kernel_size * kernel_size
        bound = float(1.0 / np.sqrt(fan_in))
        w = jax.random.uniform(kw_, (cout, cin, kernel_size, kernel_size),
                               jnp.float32, -bound, bound)
        b = jax.random.uniform(kb, (cout,), jnp.float32, -bound, bound)
        return w, b

    k1, k2, k3 = jax.random.split(key, 3)
    w1, b1 = conv_layer(k1, in_channels, channels_hidden)
    w2, b2 = conv_layer(k2, channels_hidden, channels_hidden)
    w3, b3 = conv_layer(k3, channels_hidden, channels)
    return {"w1": w1, "b1": b1, "w2": w2, "b2": b2, "w3": w3, "b3": b3}


def reference_forward(x_nchw, params, leaky_slope=0.1):
    """Plain-JAX reference matching the PyTorch module (batch_norm=False)."""
    def conv(x, w, b):
        y = jax.lax.conv_general_dilated(
            x, w, window_strides=(1, 1), padding="SAME",
            dimension_numbers=("NCHW", "OIHW", "NCHW"))
        return y + b.reshape(1, -1, 1, 1)

    h = conv(x_nchw, params["w1"], params["b1"])
    h = jnp.where(h >= 0, h, leaky_slope * h)
    h = conv(h, params["w2"], params["b2"])
    h = jnp.where(h >= 0, h, leaky_slope * h)
    return conv(h, params["w3"], params["b3"])


if __name__ == "__main__":
    B, in_channels, H, W = 2, 4, 16, 16
    channels, channels_hidden = 6, 8

    key = jax.random.PRNGKey(0)
    kx, kp = jax.random.split(key)
    x = jax.random.normal(kx, (B, in_channels, H, W), jnp.float32)
    params = init_params(kp, in_channels, channels, channels_hidden)

    out = jax.block_until_ready(f_conv_pallas(x, params))

    ref = reference_forward(x, params)
    assert out.shape == (B, channels, H, W)
    err = float(jnp.max(jnp.abs(out - ref)))
    assert jnp.allclose(out, ref, atol=2e-2, rtol=2e-2), err

    print("KERNEL_OK")
</pallas_src>

<mosaic_0001>
module attributes {stable_mosaic.version = 11 : i64} {
  func.func @_f_conv_kernel(%arg0: i32, %arg1: memref<1x4x256xf32, #tpu.memory_space<vmem>>, %arg2: memref<9x1x256xf32, #tpu.memory_space<vmem>>, %arg3: memref<8x36xf32, #tpu.memory_space<vmem>>, %arg4: memref<8x1xf32, #tpu.memory_space<vmem>>, %arg5: memref<8x72xf32, #tpu.memory_space<vmem>>, %arg6: memref<8x1xf32, #tpu.memory_space<vmem>>, %arg7: memref<6x72xf32, #tpu.memory_space<vmem>>, %arg8: memref<6x1xf32, #tpu.memory_space<vmem>>, %arg9: memref<1x6x256xf32, #tpu.memory_space<vmem>>) attributes {dimension_semantics = [#tpu.dimension_semantics<parallel>], iteration_bounds = array<i64: 2>, scalar_prefetch = 0 : i64, scratch_operands = 0 : i64, tpu.core_type = #tpu.core_type<tc>, window_params = [{transform_indices = @transform_0, window_bounds = array<i64: 1, 4, 256>}, {pipeline_mode = #tpu.pipeline_mode<synchronous>, transform_indices = @transform_1, window_bounds = array<i64: 9, 1, 256>}, {pipeline_mode = #tpu.pipeline_mode<synchronous>, transform_indices = @transform_2, window_bounds = array<i64: 8, 36>}, {pipeline_mode = #tpu.pipeline_mode<synchronous>, transform_indices = @transform_3, window_bounds = array<i64: 8, 1>}, {pipeline_mode = #tpu.pipeline_mode<synchronous>, transform_indices = @transform_4, window_bounds = array<i64: 8, 72>}, {pipeline_mode = #tpu.pipeline_mode<synchronous>, transform_indices = @transform_5, window_bounds = array<i64: 8, 1>}, {pipeline_mode = #tpu.pipeline_mode<synchronous>, transform_indices = @transform_6, window_bounds = array<i64: 6, 72>}, {pipeline_mode = #tpu.pipeline_mode<synchronous>, transform_indices = @transform_7, window_bounds = array<i64: 6, 1>}, {transform_indices = @transform_8, window_bounds = array<i64: 1, 6, 256>}]} {
    %c0 = arith.constant 0 : index
    %c0_0 = arith.constant 0 : index
    %c0_1 = arith.constant 0 : index
    %0 = vector.load %arg1[%c0, %c0_0, %c0_1] : memref<1x4x256xf32, #tpu.memory_space<vmem>>, vector<1x4x256xf32>
    %1 = vector.shape_cast %0 : vector<1x4x256xf32> to vector<4x256xf32>
    %c17_i32 = arith.constant 17 : i32
    %2 = tpu.dynamic_rotate %1 by %c17_i32 dim 1 : vector<4x256xf32>, i32 -> vector<4x256xf32>
    %c0_2 = arith.constant 0 : index
    %c0_3 = arith.constant 0 : index
    %c0_4 = arith.constant 0 : index
    %3 = vector.load %arg2[%c0_2, %c0_3, %c0_4] : memref<9x1x256xf32, #tpu.memory_space<vmem>>, vector<1x1x256xf32>
    %4 = vector.shape_cast %3 : vector<1x1x256xf32> to vector<1x256xf32>
    %5 = vector.broadcast %4 : vector<1x256xf32> to vector<4x256xf32>
    %6 = arith.mulf %2, %5 : vector<4x256xf32>
    %c16_i32 = arith.constant 16 : i32
    %7 = tpu.dynamic_rotate %1 by %c16_i32 dim 1 : vector<4x256xf32>, i32 -> vector<4x256xf32>
    %c1 = arith.constant 1 : index
    %c0_5 = arith.constant 0 : index
    %c0_6 = arith.constant 0 : index
    %8 = vector.load %arg2[%c1, %c0_5, %c0_6] : memref<9x1x256xf32, #tpu.memory_space<vmem>>, vector<1x1x256xf32>
    %9 = vector.shape_cast %8 : vector<1x1x256xf32> to vector<1x256xf32>
    %10 = vector.broadcast %9 : vector<1x256xf32> to vector<4x256xf32>
    %11 = arith.mulf %7, %10 : vector<4x256xf32>
    %c15_i32 = arith.constant 15 : i32
    %12 = tpu.dynamic_rotate %1 by %c15_i32 dim 1 : vector<4x256xf32>, i32 -> vector<4x256xf32>
    %c2 = arith.constant 2 : index
    %c0_7 = arith.constant 0 : index
    %c0_8 = arith.constant 0 : index
    %13 = vector.load %arg2[%c2, %c0_7, %c0_8] : memref<9x1x256xf32, #tpu.memory_space<vmem>>, vector<1x1x256xf32>
    %14 = vector.shape_cast %13 : vector<1x1x256xf32> to vector<1x256xf32>
    %15 = vector.broadcast %14 : vector<1x256xf32> to vector<4x256xf32>
    %16 = arith.mulf %12, %15 : vector<4x256xf32>
    %c1_i32 = arith.constant 1 : i32
    %17 = tpu.dynamic_rotate %1 by %c1_i32 dim 1 : vector<4x256xf32>, i32 -> vector<4x256xf32>
    %c3 = arith.constant 3 : index
    %c0_9 = arith.constant 0 : index
    %c0_10 = arith.constant 0 : index
    %18 = vector.load %arg2[%c3, %c0_9, %c0_10] : memref<9x1x256xf32, #tpu.memory_space<vmem>>, vector<1x1x256xf32>
    %19 = vector.shape_cast %18 : vector<1x1x256xf32> to vector<1x256xf32>
    %20 = vector.broadcast %19 : vector<1x256xf32> to vector<4x256xf32>
    %21 = arith.mulf %17, %20 : vector<4x256xf32>
    %c255_i32 = arith.constant 255 : i32
    %22 = tpu.dynamic_rotate %1 by %c255_i32 dim 1 : vector<4x256xf32>, i32 -> vector<4x256xf32>
    %c5 = arith.constant 5 : index
    %c0_11 = arith.constant 0 : index
    %c0_12 = arith.constant 0 : index
    %23 = vector.load %arg2[%c5, %c0_11, %c0_12] : memref<9x1x256xf32, #tpu.memory_space<vmem>>, vector<1x1x256xf32>
    %24 = vector.shape_cast %23 : vector<1x1x256xf32> to vector<1x256xf32>
    %25 = vector.broadcast %24 : vector<1x256xf32> to vector<4x256xf32>
    %26 = arith.mulf %22, %25 : vector<4x256xf32>
    %c241_i32 = arith.constant 241 : i32
    %27 = tpu.dynamic_rotate %1 by %c241_i32 dim 1 : vector<4x256xf32>, i32 -> vector<4x256xf32>
    %c6 = arith.constant 6 : index
    %c0_13 = arith.constant 0 : index
    %c0_14 = arith.constant 0 : index
    %28 = vector.load %arg2[%c6, %c0_13, %c0_14] : memref<9x1x256xf32, #tpu.memory_space<vmem>>, vector<1x1x256xf32>
    %29 = vector.shape_cast %28 : vector<1x1x256xf32> to vector<1x256xf32>
    %30 = vector.broadcast %29 : vector<1x256xf32> to vector<4x256xf32>
    %31 = arith.mulf %27, %30 : vector<4x256xf32>
    %c240_i32 = arith.constant 240 : i32
    %32 = tpu.dynamic_rotate %1 by %c240_i32 dim 1 : vector<4x256xf32>, i32 -> vector<4x256xf32>
    %c7 = arith.constant 7 : index
    %c0_15 = arith.constant 0 : index
    %c0_16 = arith.constant 0 : index
    %33 = vector.load %arg2[%c7, %c0_15, %c0_16] : memref<9x1x256xf32, #tpu.memory_space<vmem>>, vector<1x1x256xf32>
    %34 = vector.shape_cast %33 : vector<1x1x256xf32> to vector<1x256xf32>
    %35 = vector.broadcast %34 : vector<1x256xf32> to vector<4x256xf32>
    %36 = arith.mulf %32, %35 : vector<4x256xf32>
    %c239_i32 = arith.constant 239 : i32
    %37 = tpu.dynamic_rotate %1 by %c239_i32 dim 1 : vector<4x256xf32>, i32 -> vector<4x256xf32>
    %c8 = arith.constant 8 : index
    %c0_17 = arith.constant 0 : index
    %c0_18 = arith.constant 0 : index
    %38 = vector.load %arg2[%c8, %c0_17, %c0_18] : memref<9x1x256xf32, #tpu.memory_space<vmem>>, vector<1x1x256xf32>
    %39 = vector.shape_cast %38 : vector<1x1x256xf32> to vector<1x256xf32>
    %40 = vector.broadcast %39 : vector<1x256xf32> to vector<4x256xf32>
    %41 = arith.mulf %37, %40 : vector<4x256xf32>
    %cst = arith.constant 0.000000e+00 : f32
    %42 = vector.broadcast %cst : f32 to vector<8x256xf32>
    %c0_19 = arith.constant 0 : index
    %c0_20 = arith.constant 0 : index
    %43 = vector.load %arg3[%c0_19, %c0_20] : memref<8x36xf32, #tpu.memory_space<vmem>>, vector<8x4xf32>
    %cst_21 = arith.constant dense<0.000000e+00> : vector<8x256xf32>
    %44 = tpu.matmul %43, %6, %cst_21 {dimension_numbers = #tpu.dot_dimension_numbers<[1], [0], [0], [1], [0, 0, 1, 1], [], []>} : vector<8x4xf32>, vector<4x256xf32>, vector<8x256xf32> -> vector<8x256xf32>
    %45 = arith.addf %42, %44 : vector<8x256xf32>
    %c0_22 = arith.constant 0 : index
    %c4 = arith.constant 4 : index
    %46 = vector.load %arg3[%c0_22, %c4] : memref<8x36xf32, #tpu.memory_space<vmem>>, vector<8x4xf32>
    %cst_23 = arith.constant dense<0.000000e+00> : vector<8x256xf32>
    %47 = tpu.matmul %46, %11, %cst_23 {dimension_numbers = #tpu.dot_dimension_numbers<[1], [0], [0], [1], [0, 0, 1, 1], [], []>} : vector<8x4xf32>, vector<4x256xf32>, vector<8x256xf32> -> vector<8x256xf32>
    %48 = arith.addf %45, %47 : vector<8x256xf32>
    %c0_24 = arith.constant 0 : index
    %c8_25 = arith.constant 8 : index
    %49 = vector.load %arg3[%c0_24, %c8_25] : memref<8x36xf32, #tpu.memory_space<vmem>>, vector<8x4xf32>
    %cst_26 = arith.constant dense<0.000000e+00> : vector<8x256xf32>
    %50 = tpu.matmul %49, %16, %cst_26 {dimension_numbers = #tpu.dot_dimension_numbers<[1], [0], [0], [1], [0, 0, 1, 1], [], []>} : vector<8x4xf32>, vector<4x256xf32>, vector<8x256xf32> -> vector<8x256xf32>
    %51 = arith.addf %48, %50 : vector<8x256xf32>
    %c0_27 = arith.constant 0 : index
    %c12 = arith.constant 12 : index
    %52 = vector.load %arg3[%c0_27, %c12] : memref<8x36xf32, #tpu.memory_space<vmem>>, vector<8x4xf32>
    %cst_28 = arith.constant dense<0.000000e+00> : vector<8x256xf32>
    %53 = tpu.matmul %52, %21, %cst_28 {dimension_numbers = #tpu.dot_dimension_numbers<[1], [0], [0], [1], [0, 0, 1, 1], [], []>} : vector<8x4xf32>, vector<4x256xf32>, vector<8x256xf32> -> vector<8x256xf32>
    %54 = arith.addf %51, %53 : vector<8x256xf32>
    %c0_29 = arith.constant 0 : index
    %c16 = arith.constant 16 : index
    %55 = vector.load %arg3[%c0_29, %c16] : memref<8x36xf32, #tpu.memory_space<vmem>>, vector<8x4xf32>
    %cst_30 = arith.constant dense<0.000000e+00> : vector<8x256xf32>
    %56 = tpu.matmul %55, %1, %cst_30 {dimension_numbers = #tpu.dot_dimension_numbers<[1], [0], [0], [1], [0, 0, 1, 1], [], []>} : vector<8x4xf32>, vector<4x256xf32>, vector<8x256xf32> -> vector<8x256xf32>
    %57 = arith.addf %54, %56 : vector<8x256xf32>
    %c0_31 = arith.constant 0 : index
    %c20 = arith.constant 20 : index
    %58 = vector.load %arg3[%c0_31, %c20] : memref<8x36xf32, #tpu.memory_space<vmem>>, vector<8x4xf32>
    %cst_32 = arith.constant dense<0.000000e+00> : vector<8x256xf32>
    %59 = tpu.matmul %58, %26, %cst_32 {dimension_numbers = #tpu.dot_dimension_numbers<[1], [0], [0], [1], [0, 0, 1, 1], [], []>} : vector<8x4xf32>, vector<4x256xf32>, vector<8x256xf32> -> vector<8x256xf32>
    %60 = arith.addf %57, %59 : vector<8x256xf32>
    %c0_33 = arith.constant 0 : index
    %c24 = arith.constant 24 : index
    %61 = vector.load %arg3[%c0_33, %c24] : memref<8x36xf32, #tpu.memory_space<vmem>>, vector<8x4xf32>
    %cst_34 = arith.constant dense<0.000000e+00> : vector<8x256xf32>
    %62 = tpu.matmul %61, %31, %cst_34 {dimension_numbers = #tpu.dot_dimension_numbers<[1], [0], [0], [1], [0, 0, 1, 1], [], []>} : vector<8x4xf32>, vector<4x256xf32>, vector<8x256xf32> -> vector<8x256xf32>
    %63 = arith.addf %60, %62 : vector<8x256xf32>
    %c0_35 = arith.constant 0 : index
    %c28 = arith.constant 28 : index
    %64 = vector.load %arg3[%c0_35, %c28] : memref<8x36xf32, #tpu.memory_space<vmem>>, vector<8x4xf32>
    %cst_36 = arith.constant dense<0.000000e+00> : vector<8x256xf32>
    %65 = tpu.matmul %64, %36, %cst_36 {dimension_numbers = #tpu.dot_dimension_numbers<[1], [0], [0], [1], [0, 0, 1, 1], [], []>} : vector<8x4xf32>, vector<4x256xf32>, vector<8x256xf32> -> vector<8x256xf32>
    %66 = arith.addf %63, %65 : vector<8x256xf32>
    %c0_37 = arith.constant 0 : index
    %c32 = arith.constant 32 : index
    %67 = vector.load %arg3[%c0_37, %c32] : memref<8x36xf32, #tpu.memory_space<vmem>>, vector<8x4xf32>
    %cst_38 = arith.constant dense<0.000000e+00> : vector<8x256xf32>
    %68 = tpu.matmul %67, %41, %cst_38 {dimension_numbers = #tpu.dot_dimension_numbers<[1], [0], [0], [1], [0, 0, 1, 1], [], []>} : vector<8x4xf32>, vector<4x256xf32>, vector<8x256xf32> -> vector<8x256xf32>
    %69 = arith.addf %66, %68 : vector<8x256xf32>
    %c0_39 = arith.constant 0 : index
    %c0_40 = arith.constant 0 : index
    %70 = vector.load %arg4[%c0_39, %c0_40] : memref<8x1xf32, #tpu.memory_space<vmem>>, vector<8x1xf32>
    %71 = vector.broadcast %70 : vector<8x1xf32> to vector<8x256xf32>
    %72 = arith.addf %69, %71 : vector<8x256xf32>
    %cst_41 = arith.constant 0.000000e+00 : f32
    %73 = vector.broadcast %cst_41 : f32 to vector<8x256xf32>
    %74 = arith.cmpf oge, %72, %73 : vector<8x256xf32>
    %cst_42 = arith.constant 1.000000e-01 : f32
    %75 = vector.broadcast %cst_42 : f32 to vector<8x256xf32>
    %76 = arith.mulf %75, %72 : vector<8x256xf32>
    %77 = arith.select %74, %72, %76 : vector<8x256xi1>, vector<8x256xf32>
    %c17_i32_43 = arith.constant 17 : i32
    %78 = tpu.dynamic_rotate %77 by %c17_i32_43 dim 1 : vector<8x256xf32>, i32 -> vector<8x256xf32>
    %c0_44 = arith.constant 0 : index
    %c0_45 = arith.constant 0 : index
    %c0_46 = arith.constant 0 : index
    %79 = vector.load %arg2[%c0_44, %c0_45, %c0_46] : memref<9x1x256xf32, #tpu.memory_space<vmem>>, vector<1x1x256xf32>
    %80 = vector.shape_cast %79 : vector<1x1x256xf32> to vector<1x256xf32>
    %81 = vector.broadcast %80 : vector<1x256xf32> to vector<8x256xf32>
    %82 = arith.mulf %78, %81 : vector<8x256xf32>
    %c16_i32_47 = arith.constant 16 : i32
    %83 = tpu.dynamic_rotate %77 by %c16_i32_47 dim 1 : vector<8x256xf32>, i32 -> vector<8x256xf32>
    %c1_48 = arith.constant 1 : index
    %c0_49 = arith.constant 0 : index
    %c0_50 = arith.constant 0 : index
    %84 = vector.load %arg2[%c1_48, %c0_49, %c0_50] : memref<9x1x256xf32, #tpu.memory_space<vmem>>, vector<1x1x256xf32>
    %85 = vector.shape_cast %84 : vector<1x1x256xf32> to vector<1x256xf32>
    %86 = vector.broadcast %85 : vector<1x256xf32> to vector<8x256xf32>
    %87 = arith.mulf %83, %86 : vector<8x256xf32>
    %c15_i32_51 = arith.constant 15 : i32
    %88 = tpu.dynamic_rotate %77 by %c15_i32_51 dim 1 : vector<8x256xf32>, i32 -> vector<8x256xf32>
    %c2_52 = arith.constant 2 : index
    %c0_53 = arith.constant 0 : index
    %c0_54 = arith.constant 0 : index
    %89 = vector.load %arg2[%c2_52, %c0_53, %c0_54] : memref<9x1x256xf32, #tpu.memory_space<vmem>>, vector<1x1x256xf32>
    %90 = vector.shape_cast %89 : vector<1x1x256xf32> to vector<1x256xf32>
    %91 = vector.broadcast %90 : vector<1x256xf32> to vector<8x256xf32>
    %92 = arith.mulf %88, %91 : vector<8x256xf32>
    %c1_i32_55 = arith.constant 1 : i32
    %93 = tpu.dynamic_rotate %77 by %c1_i32_55 dim 1 : vector<8x256xf32>, i32 -> vector<8x256xf32>
    %c3_56 = arith.constant 3 : index
    %c0_57 = arith.constant 0 : index
    %c0_58 = arith.constant 0 : index
    %94 = vector.load %arg2[%c3_56, %c0_57, %c0_58] : memref<9x1x256xf32, #tpu.memory_space<vmem>>, vector<1x1x256xf32>
    %95 = vector.shape_cast %94 : vector<1x1x256xf32> to vector<1x256xf32>
    %96 = vector.broadcast %95 : vector<1x256xf32> to vector<8x256xf32>
    %97 = arith.mulf %93, %96 : vector<8x256xf32>
    %c255_i32_59 = arith.constant 255 : i32
    %98 = tpu.dynamic_rotate %77 by %c255_i32_59 dim 1 : vector<8x256xf32>, i32 -> vector<8x256xf32>
    %c5_60 = arith.constant 5 : index
    %c0_61 = arith.constant 0 : index
    %c0_62 = arith.constant 0 : index
    %99 = vector.load %arg2[%c5_60, %c0_61, %c0_62] : memref<9x1x256xf32, #tpu.memory_space<vmem>>, vector<1x1x256xf32>
    %100 = vector.shape_cast %99 : vector<1x1x256xf32> to vector<1x256xf32>
    %101 = vector.broadcast %100 : vector<1x256xf32> to vector<8x256xf32>
    %102 = arith.mulf %98, %101 : vector<8x256xf32>
    %c241_i32_63 = arith.constant 241 : i32
    %103 = tpu.dynamic_rotate %77 by %c241_i32_63 dim 1 : vector<8x256xf32>, i32 -> vector<8x256xf32>
    %c6_64 = arith.constant 6 : index
    %c0_65 = arith.constant 0 : index
    %c0_66 = arith.constant 0 : index
    %104 = vector.load %arg2[%c6_64, %c0_65, %c0_66] : memref<9x1x256xf32, #tpu.memory_space<vmem>>, vector<1x1x256xf32>
    %105 = vector.shape_cast %104 : vector<1x1x256xf32> to vector<1x256xf32>
    %106 = vector.broadcast %105 : vector<1x256xf32> to vector<8x256xf32>
    %107 = arith.mulf %103, %106 : vector<8x256xf32>
    %c240_i32_67 = arith.constant 240 : i32
    %108 = tpu.dynamic_rotate %77 by %c240_i32_67 dim 1 : vector<8x256xf32>, i32 -> vector<8x256xf32>
    %c7_68 = arith.constant 7 : index
    %c0_69 = arith.constant 0 : index
    %c0_70 = arith.constant 0 : index
    %109 = vector.load %arg2[%c7_68, %c0_69, %c0_70] : memref<9x1x256xf32, #tpu.memory_space<vmem>>, vector<1x1x256xf32>
    %110 = vector.shape_cast %109 : vector<1x1x256xf32> to vector<1x256xf32>
    %111 = vector.broadcast %110 : vector<1x256xf32> to vector<8x256xf32>
    %112 = arith.mulf %108, %111 : vector<8x256xf32>
    %c239_i32_71 = arith.constant 239 : i32
    %113 = tpu.dynamic_rotate %77 by %c239_i32_71 dim 1 : vector<8x256xf32>, i32 -> vector<8x256xf32>
    %c8_72 = arith.constant 8 : index
    %c0_73 = arith.constant 0 : index
    %c0_74 = arith.constant 0 : index
    %114 = vector.load %arg2[%c8_72, %c0_73, %c0_74] : memref<9x1x256xf32, #tpu.memory_space<vmem>>, vector<1x1x256xf32>
    %115 = vector.shape_cast %114 : vector<1x1x256xf32> to vector<1x256xf32>
    %116 = vector.broadcast %115 : vector<1x256xf32> to vector<8x256xf32>
    %117 = arith.mulf %113, %116 : vector<8x256xf32>
    %118 = tpu.concatenate %82, %87, %92, %97, %77, %102, %107, %112, %117 in 0 : vector<8x256xf32>, vector<8x256xf32>, vector<8x256xf32>, vector<8x256xf32>, vector<8x256xf32>, vector<8x256xf32>, vector<8x256xf32>, vector<8x256xf32>, vector<8x256xf32> -> vector<72x256xf32>
    %c0_75 = arith.constant 0 : index
    %c0_76 = arith.constant 0 : index
    %119 = vector.load %arg5[%c0_75, %c0_76] : memref<8x72xf32, #tpu.memory_space<vmem>>, vector<8x72xf32>
    %cst_77 = arith.constant dense<0.000000e+00> : vector<8x256xf32>
    %120 = tpu.matmul %119, %118, %cst_77 {dimension_numbers = #tpu.dot_dimension_numbers<[1], [0], [0], [1], [0, 0, 1, 1], [], []>} : vector<8x72xf32>, vector<72x256xf32>, vector<8x256xf32> -> vector<8x256xf32>
    %c0_78 = arith.constant 0 : index
    %c0_79 = arith.constant 0 : index
    %121 = vector.load %arg6[%c0_78, %c0_79] : memref<8x1xf32, #tpu.memory_space<vmem>>, vector<8x1xf32>
    %122 = vector.broadcast %121 : vector<8x1xf32> to vector<8x256xf32>
    %123 = arith.addf %120, %122 : vector<8x256xf32>
    %cst_80 = arith.constant 0.000000e+00 : f32
    %124 = vector.broadcast %cst_80 : f32 to vector<8x256xf32>
    %125 = arith.cmpf oge, %123, %124 : vector<8x256xf32>
    %cst_81 = arith.constant 1.000000e-01 : f32
    %126 = vector.broadcast %cst_81 : f32 to vector<8x256xf32>
    %127 = arith.mulf %126, %123 : vector<8x256xf32>
    %128 = arith.select %125, %123, %127 : vector<8x256xi1>, vector<8x256xf32>
    %c17_i32_82 = arith.constant 17 : i32
    %129 = tpu.dynamic_rotate %128 by %c17_i32_82 dim 1 : vector<8x256xf32>, i32 -> vector<8x256xf32>
    %c0_83 = arith.constant 0 : index
    %c0_84 = arith.constant 0 : index
    %c0_85 = arith.constant 0 : index
    %130 = vector.load %arg2[%c0_83, %c0_84, %c0_85] : memref<9x1x256xf32, #tpu.memory_space<vmem>>, vector<1x1x256xf32>
    %131 = vector.shape_cast %130 : vector<1x1x256xf32> to vector<1x256xf32>
    %132 = vector.broadcast %131 : vector<1x256xf32> to vector<8x256xf32>
    %133 = arith.mulf %129, %132 : vector<8x256xf32>
    %c16_i32_86 = arith.constant 16 : i32
    %134 = tpu.dynamic_rotate %128 by %c16_i32_86 dim 1 : vector<8x256xf32>, i32 -> vector<8x256xf32>
    %c1_87 = arith.constant 1 : index
    %c0_88 = arith.constant 0 : index
    %c0_89 = arith.constant 0 : index
    %135 = vector.load %arg2[%c1_87, %c0_88, %c0_89] : memref<9x1x256xf32, #tpu.memory_space<vmem>>, vector<1x1x256xf32>
    %136 = vector.shape_cast %135 : vector<1x1x256xf32> to vector<1x256xf32>
    %137 = vector.broadcast %136 : vector<1x256xf32> to vector<8x256xf32>
    %138 = arith.mulf %134, %137 : vector<8x256xf32>
    %c15_i32_90 = arith.constant 15 : i32
    %139 = tpu.dynamic_rotate %128 by %c15_i32_90 dim 1 : vector<8x256xf32>, i32 -> vector<8x256xf32>
    %c2_91 = arith.constant 2 : index
    %c0_92 = arith.constant 0 : index
    %c0_93 = arith.constant 0 : index
    %140 = vector.load %arg2[%c2_91, %c0_92, %c0_93] : memref<9x1x256xf32, #tpu.memory_space<vmem>>, vector<1x1x256xf32>
    %141 = vector.shape_cast %140 : vector<1x1x256xf32> to vector<1x256xf32>
    %142 = vector.broadcast %141 : vector<1x256xf32> to vector<8x256xf32>
    %143 = arith.mulf %139, %142 : vector<8x256xf32>
    %c1_i32_94 = arith.constant 1 : i32
    %144 = tpu.dynamic_rotate %128 by %c1_i32_94 dim 1 : vector<8x256xf32>, i32 -> vector<8x256xf32>
    %c3_95 = arith.constant 3 : index
    %c0_96 = arith.constant 0 : index
    %c0_97 = arith.constant 0 : index
    %145 = vector.load %arg2[%c3_95, %c0_96, %c0_97] : memref<9x1x256xf32, #tpu.memory_space<vmem>>, vector<1x1x256xf32>
    %146 = vector.shape_cast %145 : vector<1x1x256xf32> to vector<1x256xf32>
    %147 = vector.broadcast %146 : vector<1x256xf32> to vector<8x256xf32>
    %148 = arith.mulf %144, %147 : vector<8x256xf32>
    %c255_i32_98 = arith.constant 255 : i32
    %149 = tpu.dynamic_rotate %128 by %c255_i32_98 dim 1 : vector<8x256xf32>, i32 -> vector<8x256xf32>
    %c5_99 = arith.constant 5 : index
    %c0_100 = arith.constant 0 : index
    %c0_101 = arith.constant 0 : index
    %150 = vector.load %arg2[%c5_99, %c0_100, %c0_101] : memref<9x1x256xf32, #tpu.memory_space<vmem>>, vector<1x1x256xf32>
    %151 = vector.shape_cast %150 : vector<1x1x256xf32> to vector<1x256xf32>
    %152 = vector.broadcast %151 : vector<1x256xf32> to vector<8x256xf32>
    %153 = arith.mulf %149, %152 : vector<8x256xf32>
    %c241_i32_102 = arith.constant 241 : i32
    %154 = tpu.dynamic_rotate %128 by %c241_i32_102 dim 1 : vector<8x256xf32>, i32 -> vector<8x256xf32>
    %c6_103 = arith.constant 6 : index
    %c0_104 = arith.constant 0 : index
    %c0_105 = arith.constant 0 : index
    %155 = vector.load %arg2[%c6_103, %c0_104, %c0_105] : memref<9x1x256xf32, #tpu.memory_space<vmem>>, vector<1x1x256xf32>
    %156 = vector.shape_cast %155 : vector<1x1x256xf32> to vector<1x256xf32>
    %157 = vector.broadcast %156 : vector<1x256xf32> to vector<8x256xf32>
    %158 = arith.mulf %154, %157 : vector<8x256xf32>
    %c240_i32_106 = arith.constant 240 : i32
    %159 = tpu.dynamic_rotate %128 by %c240_i32_106 dim 1 : vector<8x256xf32>, i32 -> vector<8x256xf32>
    %c7_107 = arith.constant 7 : index
    %c0_108 = arith.constant 0 : index
    %c0_109 = arith.constant 0 : index
    %160 = vector.load %arg2[%c7_107, %c0_108, %c0_109] : memref<9x1x256xf32, #tpu.memory_space<vmem>>, vector<1x1x256xf32>
    %161 = vector.shape_cast %160 : vector<1x1x256xf32> to vector<1x256xf32>
    %162 = vector.broadcast %161 : vector<1x256xf32> to vector<8x256xf32>
    %163 = arith.mulf %159, %162 : vector<8x256xf32>
    %c239_i32_110 = arith.constant 239 : i32
    %164 = tpu.dynamic_rotate %128 by %c239_i32_110 dim 1 : vector<8x256xf32>, i32 -> vector<8x256xf32>
    %c8_111 = arith.constant 8 : index
    %c0_112 = arith.constant 0 : index
    %c0_113 = arith.constant 0 : index
    %165 = vector.load %arg2[%c8_111, %c0_112, %c0_113] : memref<9x1x256xf32, #tpu.memory_space<vmem>>, vector<1x1x256xf32>
    %166 = vector.shape_cast %165 : vector<1x1x256xf32> to vector<1x256xf32>
    %167 = vector.broadcast %166 : vector<1x256xf32> to vector<8x256xf32>
    %168 = arith.mulf %164, %167 : vector<8x256xf32>
    %169 = tpu.concatenate %133, %138, %143, %148, %128, %153, %158, %163, %168 in 0 : vector<8x256xf32>, vector<8x256xf32>, vector<8x256xf32>, vector<8x256xf32>, vector<8x256xf32>, vector<8x256xf32>, vector<8x256xf32>, vector<8x256xf32>, vector<8x256xf32> -> vector<72x256xf32>
    %c0_114 = arith.constant 0 : index
    %c0_115 = arith.constant 0 : index
    %170 = vector.load %arg7[%c0_114, %c0_115] : memref<6x72xf32, #tpu.memory_space<vmem>>, vector<6x72xf32>
    %cst_116 = arith.constant dense<0.000000e+00> : vector<6x256xf32>
    %171 = tpu.matmul %170, %169, %cst_116 {dimension_numbers = #tpu.dot_dimension_numbers<[1], [0], [0], [1], [0, 0, 1, 1], [], []>} : vector<6x72xf32>, vector<72x256xf32>, vector<6x256xf32> -> vector<6x256xf32>
    %c0_117 = arith.constant 0 : index
    %c0_118 = arith.constant 0 : index
    %172 = vector.load %arg8[%c0_117, %c0_118] : memref<6x1xf32, #tpu.memory_space<vmem>>, vector<6x1xf32>
    %173 = vector.broadcast %172 : vector<6x1xf32> to vector<6x256xf32>
    %174 = arith.addf %171, %173 : vector<6x256xf32>
    %c0_119 = arith.constant 0 : index
    %c0_120 = arith.constant 0 : index
    %c0_121 = arith.constant 0 : index
    %175 = vector.load %arg9[%c0_119, %c0_120, %c0_121] : memref<1x6x256xf32, #tpu.memory_space<vmem>>, vector<1x6x256xf32>
    %176 = vector.shape_cast %175 : vector<1x6x256xf32> to vector<6x256xf32>
    %177 = vector.shape_cast %174 : vector<6x256xf32> to vector<1x6x256xf32>
    tpu.vector_store %arg9[%c0_119, %c0_120, %c0_121], %177 {strides = array<i32>} : memref<1x6x256xf32, #tpu.memory_space<vmem>>, vector<1x6x256xf32>,
    return
  }
  func.func @transform_0(%arg0: i32) -> (i32, i32, i32) {
    %c0_i32 = arith.constant 0 : i32
    %c0_i32_0 = arith.constant 0 : i32
    %c0_i32_1 = arith.constant 0 : i32
    return %arg0, %c0_i32, %c0_i32_0 : i32, i32, i32
  }
  func.func @transform_1(%arg0: i32) -> (i32, i32, i32) {
    %c0_i32 = arith.constant 0 : i32
    %c0_i32_0 = arith.constant 0 : i32
    %c0_i32_1 = arith.constant 0 : i32
    %c0_i32_2 = arith.constant 0 : i32
    return %c0_i32, %c0_i32_0, %c0_i32_1 : i32, i32, i32
  }
  func.func @transform_2(%arg0: i32) -> (i32, i32) {
    %c0_i32 = arith.constant 0 : i32
    %c0_i32_0 = arith.constant 0 : i32
    %c0_i32_1 = arith.constant 0 : i32
    return %c0_i32, %c0_i32_0 : i32, i32
  }
  func.func @transform_3(%arg0: i32) -> (i32, i32) {
    %c0_i32 = arith.constant 0 : i32
    %c0_i32_0 = arith.constant 0 : i32
    %c0_i32_1 = arith.constant 0 : i32
    return %c0_i32, %c0_i32_0 : i32, i32
  }
  func.func @transform_4(%arg0: i32) -> (i32, i32) {
    %c0_i32 = arith.constant 0 : i32
    %c0_i32_0 = arith.constant 0 : i32
    %c0_i32_1 = arith.constant 0 : i32
    return %c0_i32, %c0_i32_0 : i32, i32
  }
  func.func @transform_5(%arg0: i32) -> (i32, i32) {
    %c0_i32 = arith.constant 0 : i32
    %c0_i32_0 = arith.constant 0 : i32
    %c0_i32_1 = arith.constant 0 : i32
    return %c0_i32, %c0_i32_0 : i32, i32
  }
  func.func @transform_6(%arg0: i32) -> (i32, i32) {
    %c0_i32 = arith.constant 0 : i32
    %c0_i32_0 = arith.constant 0 : i32
    %c0_i32_1 = arith.constant 0 : i32
    return %c0_i32, %c0_i32_0 : i32, i32
  }
  func.func @transform_7(%arg0: i32) -> (i32, i32) {
    %c0_i32 = arith.constant 0 : i32
    %c0_i32_0 = arith.constant 0 : i32
    %c0_i32_1 = arith.constant 0 : i32
    return %c0_i32, %c0_i32_0 : i32, i32
  }
  func.func @transform_8(%arg0: i32) -> (i32, i32, i32) {
    %c0_i32 = arith.constant 0 : i32
    %c0_i32_0 = arith.constant 0 : i32
    %c0_i32_1 = arith.constant 0 : i32
    return %arg0, %c0_i32, %c0_i32_0 : i32, i32, i32
  }
}

</mosaic_0001>

<bundles_post_ra>
// kernel: tpu_custom_call.1
= control target key start
LH: loop header
LB: loop body
LE: loop exit
PB: predicated region body
PF: predicated region fallthrough
CT: control target
= control target key end

     0   :  { %13 = vsyncpa [#allocation3], 0  ;;  %s2417_s0 = inlined_call_operand.hbm [shape: f32[2,4,256], index: 0, kind: input, shape index: {}]   ;;  %s2418_s1 = inlined_call_operand.vmem [shape: f32[9,1,256], index: 1, kind: input, shape index: {}]   ;;  %s2419_s2 = inlined_call_operand.vmem [shape: f32[8,36], index: 2, kind: input, shape index: {}]   ;;  %s2420_s3 = inlined_call_operand.vmem [shape: f32[8,1], index: 3, kind: input, shape index: {}]   ;;  %s2421_s4 = inlined_call_operand.vmem [shape: f32[8,72], index: 4, kind: input, shape index: {}]   ;;  %s2422_s5 = inlined_call_operand.vmem [shape: f32[8,1], index: 5, kind: input, shape index: {}]   ;;  %s2423_s6 = inlined_call_operand.vmem [shape: f32[6,72], index: 6, kind: input, shape index: {}]   ;;  %s2424_s7 = inlined_call_operand.vmem [shape: f32[6,1], index: 7, kind: input, shape index: {}]   ;;  %s2425_s8 = inlined_call_operand.vmem [shape: f32[2,6,256], index: 8, kind: output, shape index: {}]  }
   0x1   :  { %15 = vsyncpa [#allocation3 + $0x1], 0  ;;  %s1916_s27 = smov 0   ;;  %s1918_s28 = smov 0  }
   0x2   :  { %s1920_s29 = smov 0   ;;  %s1922_s30 = smov 0  }
   0x3 LB: > { %s1935_s9 = sadd.s32 4294967295, %s1851_s30   ;;  %s1938_s10 = sadd.s32 1, %s1851_s30   ;;  %s1851_s30 = sphi %s1922_s30, %s2433_s30   ;;  %s1847_s29 = sphi %s1920_s29, %s2432_s29   ;;  %s1843_s28 = sphi %s1918_s28, %s2431_s28   ;;  %s1839_s27 = sphi %s1916_s27, %s2430_s27  }
   0x4   : > { %s25_s11 = ssub.s32 %s1851_s30, %s1938_s10  ;;  %s28_s12 = sadd.s32 1, %s1847_s29 }
   0x5   : > { %p26_p0 = scmp.eq.s32.totalorder %s25_s11, 0  ;;  %p35_p1 = scmp.ne.s32.totalorder %s1847_s29, %s1843_s28 }
   0x6   : > { %p36_p2 = scmp.eq.s32.totalorder %s1851_s30, 0  ;;  %p41_p3 = scmp.ne.s32.totalorder %s1843_s28, %s1839_s27 }
   0x7   : > { %s1948_s13 = scalar_select %p26_p0, %s1847_s29, %s28_s12  }
   0x8   : > { %p37_p4 = por %p36_p2, %p35_p1  ;;  %p42_p5 = scmp.eq.s32.totalorder %s1935_s9, 0 }
   0x9   : > { %p1734_p6 = scmp.lt.s32.totalorder %s1851_s30, 2  ;;  %s259_s15 = sand.u32 1, %s1847_s29  }
   0xa   : > { %p1952_p7 = por %p42_p5, %p41_p3  ;;  %s1633_s16 = sshll.u32 %s259_s15, 3 }
   0xb   : > { %s1678_s17 = sshll.u32 %s1851_s30, 7  ;;  %s263_s21 = scalar_lea.vmem [#allocation2], %s1633_s16 }
   0xc   : > { %s1961_s20 = scalar_lea.hbm %s2417_s0, %s1678_s17  ;;  %s271_s22 = sshll.u32 %s263_s21, 4  ;;  %s1963_s22 = int_to_ptr.vmem [resolvable:$true] %s271_s22 }
   0xd   : > { %p1965_p8 = pnand %p1734_p6, %p37_p4  ;;  %s260_s24 = scalar_lea.sflag [#allocation3], %s259_s15 }
   0xe   : > { %s1787_s25 = scalar_lea.hbm %s1961_s20, 128  ;;  %s1792_s11 = scalar_lea.hbm %s2417_s0, 256 }
   0xf   : > { %p1788_p11 = scmp.ne.s32.totalorder %s1961_s20, %s1787_s25  ;;  %p1789_p12 = pneg %p1965_p8 }
  0x10   : > { %p1793_p1 = scmp.lt.u32.totalorder %s1961_s20, %s2417_s0  ;;  %p1794_p2 = scmp.lt.u32.totalorder %s1792_s11, %s1787_s25 }
  0x11   : > { %p1790_p13 = pnand %p1789_p12, %p1788_p11  ;;  %p1796_p4 = scmp.lt.u32.totalorder %s1787_s25, %s1961_s20 }
  0x12   : > { %p1795_p3 = por %p1794_p2, %p1793_p1 }
  0x13   : > { %p1791_p0 = pneg %p1790_p13 }
  0x14   : > { %p1797_p5 = por %p1796_p4, %p1795_p3 }
  0x16   : > { %p1798_p6 = pnand %p1797_p5, %p1791_p0 }
  0x18   : > { %1801 = shalt.err (!%p1798_p6)
}
  0x19   : > { %s1802_s15 = scalar_lea.vmem %s1963_s22, 128  ;;  %s1853_s17 = smov [#allocation2]  }
  0x1a   : > { %p1803_p11 = scmp.ne.s32.totalorder %s1963_s22, %s1802_s15  ;;  %s1807_s18 = sshll.u32 %s1853_s17, 4  ;;  %s1808_s18 = int_to_ptr.vmem [resolvable:$false] %s1807_s18 }
  0x1b   : > { %s1809_s19 = scalar_lea.vmem %s1808_s18, 256  ;;  %p1810_p10 = scmp.lt.s32.totalorder %s1963_s22, %s1808_s18 }
  0x1c   : > { %p1805_p13 = pnand %p1803_p11, %p1789_p12  ;;  %p1811_p1 = scmp.lt.s32.totalorder %s1809_s19, %s1802_s15 }
  0x1e   : > { %p1806_p9 = pneg %p1805_p13  ;;  %p1812_p2 = por %p1811_p1, %p1810_p10 }
  0x20   : > { %p1813_p3 = pnand %p1812_p2, %p1806_p9 }
  0x22   : > { %1816 = shalt.err (!%p1813_p3)
}
  0x23   : > { %1733 = dma.hbm_to_vmem [thread:$0]  (!%p1965_p8), %s1961_s20, 128, %s1963_s22, %s260_s24  }
  0x24   : > { %p2428_p0 = scmp.lt.s32.totalorder %s1851_s30, 3  ;;  %p2429_p4 = scmp.ge.s32.totalorder %s1851_s30, 1 }
  0x26   : > { %p277_p12 = pnand %p2429_p4, %p2428_p0 }
  0x27   : > { %s282_s21 = sand.u32 (!%p277_p12), 1, %s1843_s28  }
  0x28   : > { %280 = sbr.rel (%p277_p12) target bundleno = 1193 (0x4a9), region = 52  ;;  %s1637_s25 = sshll.u32 (!%p277_p12), %s282_s21, 3 }
  0x29   : > { %s283_s26 = scalar_lea.sflag (!%p277_p12), [#allocation3], %s282_s21  ;;  %s286_s27 = scalar_lea.vmem (!%p277_p12), [#allocation2], %s1637_s25 }
  0x2f   : > { %1834 = dma.done.wait (%p1952_p7), %s283_s26, 128  }
  0x30   : > { %1836 = vsyncadd (%p1952_p7), %s283_s26, 4294967168  ;;  %v1854_v0 = vmov 0.0   ;;  %v2007_v1 = vld [vmem:[%s286_s27] sm:$0xff]  ;;  %s1855_s22 = smov 16   ;;  %s1856_s23 = smov 124   ;;  %v1870_v5 = vmov 0   ;;  %v332_v6 = vlaneseq }
  0x31   : > { %583 = vmatprep.mubr.f32.mxu0 %v1854_v0  ;;  %1403 = vmatprep.mubr.f32.mxu1 %v1854_v0  ;;  %v2012_v2 = vld [vmem:[%s2419_s2] sm:$0xff]  ;;  %v2019_v3 = vcombine.high %v2007_v1, %v2007_v1  ;;  %s1857_s14 = smov 17   ;;  %s1858_s24 = smov 15   ;;  %vm512_vm1 = vcmask 1043456   ;;  %vm509_vm3 = vcmask 31744   ;;  %vm1335_vm12 = vcmask 588800  }
  0x32   : > { %351 = vrot.lane.b32.xlu0 %v2007_v1, %s1855_s22  ;;  %507 = vrot.lane.b32.xlu1 %v2012_v2, %s1856_s23  ;;  %s1859_s11 = smov 120   ;;  %s1860_s12 = smov 1   ;;  %v1250_v4 = vld [vmem:[%s2420_s3] sm:$0xff]  ;;  %v340_v7 = vshrl.u32 %v332_v6, 7  ;;  %v2062_v8 = vand.u32 127, %v332_v6 }
  0x33   : > { %s1861_s16 = smov 116   ;;  %s1862_s15 = smov 112   ;;  %1784 = vset.pattern.permute.xlu0 %v1870_v5  ;;  %1785 = vset.pattern.permute.xlu1 %v1870_v5  ;;  %v1640_v11 = vld [vmem:[%s2418_s1 + $0x2] sm:$0x3]  ;;  %v337_v16 = vld [vmem:[%s2418_s1] sm:$0x3] }
  0x34   : > { %s1863_s17 = smov 127   ;;  %s1864_s18 = smov 108   ;;  %v2064_v9 = vsub.s32 0, %v340_v7  ;;  %v2066_v10 = vsub.s32 1, %v340_v7  ;;  %vm355_vm0 = vcmp.lt.s32.totalorder %v2062_v8, 16  ;;  %vm334_vm2 = vcmp.lt.s32.totalorder %v2062_v8, 17 }
  0x35   : > { %s1865_s19 = smov 113   ;;  %s1866_s21 = smov 104   ;;  %v1641_v25 = vld [vmem:[%s2418_s1 + $0x4] sm:$0x3]  ;;  %vm377_vm4 = vcmp.lt.s32.totalorder %v2062_v8, 15  ;;  %vm399_vm5 = vcmp.lt.s32.totalorder %v2062_v8, 1 }
  0x36   : > { %353 = vrot.lane.b32.xlu0 %v2019_v3, %s1855_s22  ;;  %328 = vrot.lane.b32.xlu1 %v2007_v1, %s1857_s14  ;;  %s1867_s25 = smov 100   ;;  %s1868_s26 = smov 111   ;;  %v2073_v14 = vrot.slane %v1640_v11, %v2064_v9  ;;  %v2076_v15 = vrot.slane %v1640_v11, %v2066_v10  ;;  %v2089_v23 = vrot.slane %v337_v16, %v2064_v9  ;;  %v1642_v34 = vld [vmem:[%s2418_s1 + $0x6] sm:$0x3]  ;;  %v1643_v52 = vld [vmem:[%s2418_s1 + $0xa] sm:$0x3] }
  0x37   : > { %s1869_s27 = smov 96   ;;  %v2092_v24 = vrot.slane %v337_v16, %v2066_v10  ;;  %v2108_v32 = vrot.slane %v1641_v25, %v2066_v10  ;;  %v2111_v33 = vrot.slane %v1641_v25, %v2064_v9  ;;  %v2126_v40 = vrot.slane %v1642_v34, %v2066_v10  ;;  %v1644_v59 = vld [vmem:[%s2418_s1 + $0xc] sm:$0x3]  ;;  %v1645_v6 = vld [vmem:[%s2418_s1 + $0xe] sm:$0x3]  ;;  %p319_p7 = scmp.lt.s32.totalorder %s1935_s9, 1 }
  0x38   : > { %v2137_v46 = vrot.slane %v1642_v34, %v2064_v9  ;;  %vm421_vm6 = vcmp.lt.s32.totalorder %v2062_v8, 127  ;;  %v2154_v54 = vrot.slane %v1643_v52, %v2066_v10  ;;  %vm443_vm7 = vcmp.lt.s32.totalorder %v2062_v8, 113 }
  0x39   : > { %v2167_v61 = vrot.slane %v1643_v52, %v2064_v9  ;;  %v2174_v63 = vrot.slane %v1644_v59, %v2066_v10  ;;  %vm465_vm8 = vcmp.lt.s32.totalorder %v2062_v8, 112  ;;  %v2187_v11 = vrot.slane %v1644_v59, %v2064_v9  ;;  %s2435_s9 = smov (!%p319_p7, %s1935_s9), 1 }
  0x3a   : > { %330 = vrot.lane.b32.xlu0 %v2019_v3, %s1857_s14  ;;  %373 = vrot.lane.b32.xlu1 %v2007_v1, %s1858_s24  ;;  %vm487_vm9 = vcmp.lt.s32.totalorder %v2062_v8, 111  ;;  %v2207_v25 = vrot.slane %v1645_v6, %v2064_v9 }
  0x3e   : > { %375 = vrot.lane.b32.xlu0 %v2019_v3, %s1858_s24  ;;  %669 = vrot.lane.b32.xlu1 %v2012_v2, %s1859_s11 }
  0x42   : > { %397 = vrot.lane.b32.xlu1 %v2019_v3, %s1860_s12  ;;  %395 = vrot.lane.b32.xlu0 %v2007_v1, %s1860_s12 }
  0x46   : > { %752 = vrot.lane.b32.xlu0 %v2012_v2, %s1861_s16  ;;  %835 = vrot.lane.b32.xlu1 %v2012_v2, %s1862_s15 }
  0x4a   : > { %419 = vrot.lane.b32.xlu1 %v2019_v3, %s1863_s17  ;;  %417 = vrot.lane.b32.xlu0 %v2007_v1, %s1863_s17 }
  0x4e   : > { %918 = vrot.lane.b32.xlu0 %v2012_v2, %s1864_s18  ;;  %439 = vrot.lane.b32.xlu1 %v2007_v1, %s1865_s19 }
  0x52   : > { %441 = vrot.lane.b32.xlu0 %v2019_v3, %s1865_s19  ;;  %1001 = vrot.lane.b32.xlu1 %v2012_v2, %s1866_s21 }
  0x56   : > { %463 = vrot.lane.b32.xlu1 %v2019_v3, %s1862_s15  ;;  %461 = vrot.lane.b32.xlu0 %v2007_v1, %s1862_s15 }
  0x5a   : > { %1084 = vrot.lane.b32.xlu0 %v2012_v2, %s1867_s25  ;;  %483 = vrot.lane.b32.xlu1 %v2007_v1, %s1868_s26 }
  0x5e   : > { %485 = vrot.lane.b32.xlu0 %v2019_v3, %s1868_s26  ;;  %1167 = vrot.lane.b32.xlu1 %v2012_v2, %s1869_s27 }
  0x62   : > { %1253 = vperm.xlu0 %1784, %v1250_v4  }
  0xa4   : > { %v352_v12 = vpop.permute.xlu0 %351  ;;  %v508_v13 = vpop.permute.xlu1 %507 }
  0xa8   : > { %v354_v17 = vpop.permute.xlu0 %353  ;;  %v329_v18 = vpop.permute.xlu1 %328 }
  0xa9   : > { %v356_v19 = vsel %vm355_vm0, %v352_v12, %v354_v17  ;;  %v357_v20 = vsel %vm355_vm0, %v354_v17, %v352_v12 }
  0xaa   : > { %v371_v21 = vmul.f32 %v2073_v14, %v357_v20  ;;  %v372_v22 = vmul.f32 %v2076_v15, %v356_v19  ;;  %v1646_v20 = vld [vmem:[%s2418_s1 + $0x10] sm:$0x3] }
  0xac   : > { %1647 = vmatprep.subr.msk.mxu0 %vm512_vm1, %v372_v22  ;;  %v331_v26 = vpop.permute.xlu0 %330  ;;  %v374_v27 = vpop.permute.xlu1 %373 }
  0xad   : > { %v335_v28 = vsel %vm334_vm2, %v329_v18, %v331_v26  ;;  %v336_v29 = vsel %vm334_vm2, %v331_v26, %v329_v18  ;;  %1648 = vmatpush1.msk.msra.mxu0 %vm512_vm1, %v371_v21 }
  0xae   : > { %v349_v30 = vmul.f32 %v2089_v23, %v336_v29  ;;  %v350_v31 = vmul.f32 %v2092_v24, %v335_v28  ;;  %1649 = vmatmul.mubr.msk.f32.vlgmr.msra.gmra.mrb[0].mxu0 %vm509_vm3, %v508_v13  ;;  %v2194_v13 = vrot.slane %v1645_v6, %v2066_v10 }
  0xaf   : > { %662 = vmatprep.mubr.f32.mxu0 %v1854_v0 }
  0xb0   : > { %1650 = vmatprep.subr.msk.mxu0 %vm512_vm1, %v350_v31  ;;  %v376_v35 = vpop.permute.xlu0 %375  ;;  %v670_v36 = vpop.permute.xlu1 %669  ;;  %v2223_v31 = vrot.slane %v1646_v20, %v2064_v9 }
  0xb1   : > { %1651 = vmatpush1.msk.msra.mxu0 %vm512_vm1, %v349_v30  ;;  %v378_v37 = vsel %vm377_vm4, %v374_v27, %v376_v35  ;;  %v379_v38 = vsel %vm377_vm4, %v376_v35, %v374_v27  ;;  %v2214_v27 = vrot.slane %v1646_v20, %v2066_v10 }
  0xb2   : > { %v394_v39 = vmul.f32 %v2108_v32, %v378_v37  ;;  %v393_v41 = vmul.f32 %v2111_v33, %v379_v38 }
  0xb4   : > { %1653 = vmatprep.subr.msk.mxu0 %vm512_vm1, %v394_v39  ;;  %v398_v42 = vpop.permute.xlu1 %397  ;;  %v396_v43 = vpop.permute.xlu0 %395 }
  0xb5   : > { %v400_v44 = vsel %vm399_vm5, %v396_v43, %v398_v42  ;;  %v401_v47 = vsel %vm399_vm5, %v398_v42, %v396_v43 }
  0xb6   : > { %1652 = vmatmul.mubr.msk.f32.vlgmr.msra.gmra.mrb[0].mxu0 %vm509_vm3, %v2012_v2  ;;  %v416_v45 = vmul.f32 %v2126_v40, %v400_v44  ;;  %v415_v50 = vmul.f32 %v2137_v46, %v401_v47 }
  0xb7   : > { %1654 = vmatpush1.msk.msra.mxu0 %vm512_vm1, %v393_v41  ;;  %743 = vmatprep.mubr.f32.mxu0 %v1854_v0 }
  0xb8   : > { %1656 = vmatprep.subr.msk.mxu0 %vm512_vm1, %v416_v45  ;;  %v753_v48 = vpop.permute.xlu0 %752  ;;  %v836_v49 = vpop.permute.xlu1 %835  ;;  %v1329_v45 = vld [vmem:[%s2422_s5] sm:$0xff] }
  0xbc   : > { %v418_v51 = vpop.permute.xlu0 %417  ;;  %v420_v53 = vpop.permute.xlu1 %419 }
  0xbd   : > { %v423_v56 = vsel %vm421_vm6, %v420_v53, %v418_v51  ;;  %v422_v62 = vsel %vm421_vm6, %v418_v51, %v420_v53 }
  0xbe   : > { %1655 = vmatmul.mubr.msk.f32.vlgmr.msra.gmra.mrb[0].mxu0 %vm509_vm3, %v670_v36  ;;  %v438_v58 = vmul.f32 %v2154_v54, %v423_v56 }
  0xbf   : > { %1657 = vmatpush1.msk.msra.mxu0 %vm512_vm1, %v415_v50  ;;  %826 = vmatprep.mubr.f32.mxu0 %v1854_v0 }
  0xc0   : > { %1659 = vmatprep.subr.msk.mxu0 %vm512_vm1, %v2019_v3  ;;  %v919_v55 = vpop.permute.xlu0 %918  ;;  %v440_v57 = vpop.permute.xlu1 %439 }
  0xc4   : > { %v442_v60 = vpop.permute.xlu0 %441  ;;  %v1002_v2 = vpop.permute.xlu1 %1001 }
  0xc5   : > { %v445_v3 = vsel %vm443_vm7, %v442_v60, %v440_v57  ;;  %v444_v12 = vsel %vm443_vm7, %v440_v57, %v442_v60 }
  0xc6   : > { %1658 = vmatmul.mubr.msk.f32.vlgmr.msra.gmra.mrb[0].mxu0 %vm509_vm3, %v753_v48  ;;  %v460_v5 = vmul.f32 %v2174_v63, %v445_v3  ;;  %v459_v18 = vmul.f32 %v2187_v11, %v444_v12 }
  0xc7   : > { %1660 = vmatpush1.msk.msra.mxu0 %vm512_vm1, %v2007_v1  ;;  %907 = vmatprep.mubr.f32.mxu0 %v1854_v0  ;;  %v437_v1 = vmul.f32 %v2167_v61, %v422_v62 }
  0xc8   : > { %1662 = vmatprep.subr.msk.mxu0 %vm512_vm1, %v438_v58  ;;  %v462_v4 = vpop.permute.xlu0 %461  ;;  %v464_v7 = vpop.permute.xlu1 %463 }
  0xc9   : > { %v467_v17 = vsel %vm465_vm8, %v464_v7, %v462_v4  ;;  %v466_v26 = vsel %vm465_vm8, %v462_v4, %v464_v7 }
  0xca   : > { %v482_v19 = vmul.f32 %v2194_v13, %v467_v17  ;;  %v481_v29 = vmul.f32 %v2207_v25, %v466_v26 }
  0xcc   : > { %v1085_v16 = vpop.permute.xlu0 %1084  ;;  %v484_v21 = vpop.permute.xlu1 %483 }
  0xce   : > { %1661 = vmatmul.mubr.msk.f32.vlgmr.msra.gmra.mrb[0].mxu0 %vm509_vm3, %v836_v49 }
  0xcf   : > { %1663 = vmatpush1.msk.msra.mxu0 %vm512_vm1, %v437_v1  ;;  %992 = vmatprep.mubr.f32.mxu0 %v1854_v0 }
  0xd0   : > { %1665 = vmatprep.subr.msk.mxu0 %vm512_vm1, %v460_v5  ;;  %v486_v22 = vpop.permute.xlu0 %485  ;;  %v1168_v35 = vpop.permute.xlu1 %1167 }
  0xd1   : > { %v489_v28 = vsel %vm487_vm9, %v486_v22, %v484_v21  ;;  %v488_v10 = vsel %vm487_vm9, %v484_v21, %v486_v22 }
  0xd2   : > { %v504_v30 = vmul.f32 %v2214_v27, %v489_v28  ;;  %v503_v34 = vmul.f32 %v2223_v31, %v488_v10 }
  0xd6   : > { %1664 = vmatmul.mubr.msk.f32.vlgmr.msra.gmra.mrb[0].mxu0 %vm509_vm3, %v919_v55 }
  0xd7   : > { %1666 = vmatpush1.msk.msra.mxu0 %vm512_vm1, %v459_v18  ;;  %1075 = vmatprep.mubr.f32.mxu0 %v1854_v0 }
  0xd8   : > { %1668 = vmatprep.subr.msk.mxu0 %vm512_vm1, %v482_v19 }
  0xde   : > { %1667 = vmatmul.mubr.msk.f32.vlgmr.msra.gmra.mrb[0].mxu0 %vm509_vm3, %v1002_v2 }
  0xdf   : > { %1669 = vmatpush1.msk.msra.mxu0 %vm512_vm1, %v481_v29  ;;  %1158 = vmatprep.mubr.f32.mxu0 %v1854_v0 }
  0xe0   : > { %1671 = vmatprep.subr.msk.mxu0 %vm512_vm1, %v504_v30 }
  0xe1   : > { %v1254_v9 = vpop.permute.xlu0 %1253 }
  0xe6   : > { %1670 = vmatmul.mubr.msk.f32.vlgmr.msra.gmra.mrb[0].mxu0 %vm509_vm3, %v1085_v16 }
  0xe7   : > { %1672 = vmatpush1.msk.msra.mxu0 %vm512_vm1, %v503_v34  ;;  %1241 = vmatprep.mubr.f32.mxu0 %v1854_v0 }
  0xee   : > { %1673 = vmatmul.mubr.msk.f32.vlgmr.msra.gmra.mrb[0].mxu0 %vm509_vm3, %v1168_v35 }
 0x1c1   : > { %v1243_v36 = vpop.f32.mrb[0].mxu0 }
 0x1c2   : > { %v1256_v37 = vadd.f32 %v1254_v9, %v1243_v36  ;;  %v1245_v38 = vpop.f32.mrb[1].mxu0 }
 0x1c3   : > { %v1257_v39 = vadd.f32 %v1254_v9, %v1245_v38 }
 0x1c4   : > { %vm1258_vm10 = vcmp.ge.f32.partialorder %v1256_v37, 0.0  ;;  %v1260_v41 = vmul.f32 0.1, %v1256_v37 }
 0x1c5   : > { %v1261_v43 = vmul.f32 0.1, %v1257_v39  ;;  %vm1259_vm11 = vcmp.ge.f32.partialorder %v1257_v39, 0.0 }
 0x1c6   : > { %v2234_v42 = vsel %vm1258_vm10, %v1256_v37, %v1260_v41 }
 0x1c7   : > { %1272 = vrot.lane.b32.xlu0 %v2234_v42, %s1855_s22  ;;  %1264 = vrot.lane.b32.xlu1 %v2234_v42, %s1857_s14  ;;  %v1263_v44 = vsel %vm1259_vm11, %v1257_v39, %v1261_v43 }
 0x1cb   : > { %1280 = vrot.lane.b32.xlu0 %v2234_v42, %s1858_s24  ;;  %1266 = vrot.lane.b32.xlu1 %v1263_v44, %s1857_s14 }
 0x1cf   : > { %1288 = vrot.lane.b32.xlu0 %v2234_v42, %s1860_s12  ;;  %1274 = vrot.lane.b32.xlu1 %v1263_v44, %s1855_s22 }
 0x1d3   : > { %1296 = vrot.lane.b32.xlu0 %v2234_v42, %s1863_s17  ;;  %1282 = vrot.lane.b32.xlu1 %v1263_v44, %s1858_s24 }
 0x1d7   : > { %1304 = vrot.lane.b32.xlu0 %v2234_v42, %s1865_s19  ;;  %1290 = vrot.lane.b32.xlu1 %v1263_v44, %s1860_s12 }
 0x1db   : > { %1312 = vrot.lane.b32.xlu0 %v2234_v42, %s1862_s15  ;;  %1298 = vrot.lane.b32.xlu1 %v1263_v44, %s1863_s17 }
 0x1df   : > { %1320 = vrot.lane.b32.xlu0 %v2234_v42, %s1868_s26  ;;  %1306 = vrot.lane.b32.xlu1 %v1263_v44, %s1865_s19 }
 0x1e3   : > { %1332 = vperm.xlu0 %1784, %v1329_v45   ;;  %1314 = vrot.lane.b32.xlu1 %v1263_v44, %s1862_s15 }
 0x1e7   : > { %1322 = vrot.lane.b32.xlu1 %v1263_v44, %s1868_s26 }
 0x239   : > { %v1273_v47 = vpop.permute.xlu0 %1272  ;;  %v1265_v48 = vpop.permute.xlu1 %1264 }
 0x23d   : > { %v1281_v49 = vpop.permute.xlu0 %1280  ;;  %v1267_v50 = vpop.permute.xlu1 %1266 }
 0x23e   : > { %v1268_v51 = vsel %vm334_vm2, %v1265_v48, %v1267_v50  ;;  %v1269_v52 = vsel %vm334_vm2, %v1267_v50, %v1265_v48 }
 0x23f   : > { %v1270_v58 = vmul.f32 %v1269_v52, %v2089_v23  ;;  %v1271_v60 = vmul.f32 %v1268_v51, %v2092_v24 }
 0x241   : > { %v1289_v53 = vpop.permute.xlu0 %1288  ;;  %v1275_v55 = vpop.permute.xlu1 %1274 }
 0x242   : > { %v1276_v56 = vsel %vm355_vm0, %v1273_v47, %v1275_v55  ;;  %v1277_v57 = vsel %vm355_vm0, %v1275_v55, %v1273_v47 }
 0x243   : > { %v1278_v59 = vmul.f32 %v1277_v57, %v2073_v14  ;;  %v1279_v62 = vmul.f32 %v1276_v56, %v2076_v15 }
 0x245   : > { %v1283_v2 = vpop.permute.xlu1 %1282  ;;  %v1680_v3 = vpack.c.bf16 %v1279_v62, %v1271_v60  ;;  %v1682_v4 = vpack.c.bf16 %v1278_v59, %v1270_v58  ;;  %v1297_v1 = vpop.permute.xlu0 %1296  ;;  %v1328_v58 = vld [vmem:[%s2421_s4] sm:$0xff] }
 0x246   : > { %v1284_v5 = vsel %vm377_vm4, %v1281_v49, %v1283_v2  ;;  %v1285_v6 = vsel %vm377_vm4, %v1283_v2, %v1281_v49 }
 0x247   : > { %1681 = vmatprep.subr.bf16.mxu1 %v1680_v3  ;;  %v1286_v17 = vmul.f32 %v1285_v6, %v2111_v33  ;;  %v1287_v18 = vmul.f32 %v1284_v5, %v2108_v32 }
 0x248   : > { %1683 = vmatpush1.bf16.msra.mxu1 %v1682_v4 }
 0x249   : > { %v1291_v7 = vpop.permute.xlu1 %1290  ;;  %v1305_v21 = vpop.permute.xlu0 %1304 }
 0x24a   : > { %v1292_v12 = vsel %vm399_vm5, %v1289_v53, %v1291_v7  ;;  %v1293_v16 = vsel %vm399_vm5, %v1291_v7, %v1289_v53 }
 0x24b   : > { %v1294_v19 = vmul.f32 %v1293_v16, %v2137_v46  ;;  %v1295_v20 = vmul.f32 %v1292_v12, %v2126_v40 }
 0x24d   : > { %v1299_v22 = vpop.permute.xlu1 %1298  ;;  %v1684_v26 = vpack.c.bf16 %v1295_v20, %v1287_v18  ;;  %v1686_v28 = vpack.c.bf16 %v1294_v19, %v1286_v17  ;;  %v1313_v37 = vpop.permute.xlu0 %1312 }
 0x24e   : > { %v1300_v29 = vsel %vm421_vm6, %v1297_v1, %v1299_v22  ;;  %v1301_v30 = vsel %vm421_vm6, %v1299_v22, %v1297_v1 }
 0x24f   : > { %v1302_v10 = vmul.f32 %v1300_v29, %v2167_v61  ;;  %v1303_v34 = vmul.f32 %v1301_v30, %v2154_v54  ;;  %1685 = vmatprep.subr.bf16.mxu1 %v1684_v26 }
 0x250   : > { %1687 = vmatpush1.bf16.msra.mxu1 %v1686_v28 }
 0x251   : > { %v1307_v35 = vpop.permute.xlu1 %1306  ;;  %v1688_v9 = vpack.c.bf16 %v1303_v34, %v1263_v44  ;;  %v1690_v36 = vpack.c.bf16 %v1302_v10, %v2234_v42  ;;  %v1321_v49 = vpop.permute.xlu0 %1320 }
 0x252   : > { %v1308_v38 = vsel %vm443_vm7, %v1305_v21, %v1307_v35  ;;  %v1309_v39 = vsel %vm443_vm7, %v1307_v35, %v1305_v21 }
 0x253   : > { %1689 = vmatprep.subr.bf16.mxu1 %v1688_v9  ;;  %v1310_v44 = vmul.f32 %v1308_v38, %v2187_v11  ;;  %v1311_v42 = vmul.f32 %v1309_v39, %v2174_v63 }
 0x254   : > { %1691 = vmatpush1.bf16.msra.mxu1 %v1690_v36 }
 0x255   : > { %v1315_v41 = vpop.permute.xlu1 %1314 }
 0x256   : > { %v1316_v43 = vsel %vm465_vm8, %v1313_v37, %v1315_v41  ;;  %v1317_v45 = vsel %vm465_vm8, %v1315_v41, %v1313_v37 }
 0x257   : > { %v1318_v47 = vmul.f32 %v1316_v43, %v2207_v25  ;;  %v1319_v48 = vmul.f32 %v1317_v45, %v2194_v13 }
 0x259   : > { %v1323_v50 = vpop.permute.xlu1 %1322  ;;  %v1692_v51 = vpack.c.bf16 %v1319_v48, %v1311_v42  ;;  %v1694_v52 = vpack.c.bf16 %v1318_v47, %v1310_v44 }
 0x25a   : > { %v1325_v53 = vsel %vm487_vm9, %v1323_v50, %v1321_v49  ;;  %v1324_v55 = vsel %vm487_vm9, %v1321_v49, %v1323_v50 }
 0x25b   : > { %v1327_v56 = vmul.f32 %v1325_v53, %v2214_v27  ;;  %1693 = vmatprep.subr.bf16.mxu1 %v1692_v51  ;;  %v1326_v57 = vmul.f32 %v1324_v55, %v2223_v31 }
 0x25c   : > { %1695 = vmatpush1.bf16.msra.mxu1 %v1694_v52 }
 0x25d   : > { %1355 = vmatprep.subr.mxu1 %v1327_v56 }
 0x260   : > { %1356 = vmatpush1.msra.mxu1 %v1326_v57 }
 0x261   : > { %1674 = vmatmul.mubr.msk.f32.vlgmr.msra.gmra.mrb[0].mxu1 %vm1335_vm12, %v1328_v58 }
 0x262   : > { %1554 = vmatprep.mubr.f32.mxu1 %v1854_v0  ;;  %v1333_v59 = vpop.permute.xlu0 %1332  ;;  %v1481_v0 = vld [vmem:[%s2424_s7] sm:$0x3f] }
 0x334   : > { %v1405_v60 = vpop.f32.mrb[0].mxu1 }
 0x335   : > { %v1406_v62 = vadd.f32 %v1405_v60, %v1333_v59  ;;  %v1407_v2 = vpop.f32.mrb[1].mxu1 }
 0x336   : > { %v1408_v3 = vadd.f32 %v1407_v2, %v1333_v59 }
 0x337   : > { %vm1410_vm13 = vcmp.ge.f32.partialorder %v1406_v62, 0.0  ;;  %v1412_v4 = vmul.f32 0.1, %v1406_v62 }
 0x338   : > { %vm1411_vm14 = vcmp.ge.f32.partialorder %v1408_v3, 0.0  ;;  %v1413_v1 = vmul.f32 0.1, %v1408_v3 }
 0x339   : > { %v2317_v5 = vsel %vm1410_vm13, %v1406_v62, %v1412_v4 }
 0x33a   : > { %v1415_v6 = vsel %vm1411_vm14, %v1408_v3, %v1413_v1  ;;  %1416 = vrot.lane.b32.xlu1 %v2317_v5, %s1857_s14 }
 0x33b   : > { %1418 = vrot.lane.b32.xlu0 %v1415_v6, %s1857_s14 }
 0x33e   : > { %1424 = vrot.lane.b32.xlu1 %v2317_v5, %s1855_s22 }
 0x33f   : > { %1426 = vrot.lane.b32.xlu0 %v1415_v6, %s1855_s22 }
 0x342   : > { %1432 = vrot.lane.b32.xlu1 %v2317_v5, %s1858_s24 }
 0x343   : > { %1434 = vrot.lane.b32.xlu0 %v1415_v6, %s1858_s24 }
 0x346   : > { %1440 = vrot.lane.b32.xlu1 %v2317_v5, %s1860_s12 }
 0x347   : > { %1442 = vrot.lane.b32.xlu0 %v1415_v6, %s1860_s12 }
 0x34a   : > { %1448 = vrot.lane.b32.xlu1 %v2317_v5, %s1863_s17 }
 0x34b   : > { %1450 = vrot.lane.b32.xlu0 %v1415_v6, %s1863_s17 }
 0x34e   : > { %1456 = vrot.lane.b32.xlu1 %v2317_v5, %s1865_s19 }
 0x34f   : > { %1458 = vrot.lane.b32.xlu0 %v1415_v6, %s1865_s19 }
 0x352   : > { %1464 = vrot.lane.b32.xlu1 %v2317_v5, %s1862_s15 }
 0x353   : > { %1466 = vrot.lane.b32.xlu0 %v1415_v6, %s1862_s15  ;;  %s1679_s15 = sshll.u32 %s2435_s9, 4 }
 0x356   : > { %1472 = vrot.lane.b32.xlu1 %v2317_v5, %s1868_s26 }
 0x357   : > { %1474 = vrot.lane.b32.xlu0 %v1415_v6, %s1868_s26  ;;  %s323_s26 = scalar_lea.vmem %s2425_s8, %s1679_s15 }
 0x35a   : > { %1484 = vperm.xlu1 %1785, %v1481_v0  }
 0x3ac   : > { %v1417_v7 = vpop.permute.xlu1 %1416 }
 0x3ad   : > { %v1419_v12 = vpop.permute.xlu0 %1418 }
 0x3ae   : > { %v1420_v16 = vsel %vm334_vm2, %v1417_v7, %v1419_v12  ;;  %v1421_v17 = vsel %vm334_vm2, %v1419_v12, %v1417_v7 }
 0x3af   : > { %v1422_v22 = vmul.f32 %v1421_v17, %v2089_v23  ;;  %v1423_v26 = vmul.f32 %v1420_v16, %v2092_v24 }
 0x3b0   : > { %v1425_v18 = vpop.permute.xlu1 %1424 }
 0x3b1   : > { %v1427_v19 = vpop.permute.xlu0 %1426 }
 0x3b2   : > { %v1428_v20 = vsel %vm355_vm0, %v1425_v18, %v1427_v19  ;;  %v1429_v21 = vsel %vm355_vm0, %v1427_v19, %v1425_v18 }
 0x3b3   : > { %v1430_v28 = vmul.f32 %v1429_v21, %v2073_v14  ;;  %v1431_v29 = vmul.f32 %v1428_v20, %v2076_v15 }
 0x3b4   : > { %v1433_v30 = vpop.permute.xlu1 %1432 }
 0x3b5   : > { %v1698_v10 = vpack.c.bf16 %v1430_v28, %v1422_v22  ;;  %v1435_v34 = vpop.permute.xlu0 %1434  ;;  %v1696_v35 = vpack.c.bf16 %v1431_v29, %v1423_v26 }
 0x3b6   : > { %v1436_v9 = vsel %vm377_vm4, %v1433_v30, %v1435_v34  ;;  %v1437_v36 = vsel %vm377_vm4, %v1435_v34, %v1433_v30 }
 0x3b7   : > { %1697 = vmatprep.subr.bf16.mxu1 %v1696_v35  ;;  %v1438_v15 = vmul.f32 %v1437_v36, %v2111_v33  ;;  %v1439_v38 = vmul.f32 %v1436_v9, %v2108_v32 }
 0x3b8   : > { %1699 = vmatpush1.bf16.msra.mxu1 %v1698_v10  ;;  %v1441_v37 = vpop.permute.xlu1 %1440 }
 0x3b9   : > { %v1443_v23 = vpop.permute.xlu0 %1442 }
 0x3ba   : > { %v1444_v24 = vsel %vm399_vm5, %v1441_v37, %v1443_v23  ;;  %v1445_v14 = vsel %vm399_vm5, %v1443_v23, %v1441_v37 }
 0x3bb   : > { %v1446_v39 = vmul.f32 %v1445_v14, %v2137_v46  ;;  %v1447_v41 = vmul.f32 %v1444_v24, %v2126_v40 }
 0x3bc   : > { %v1449_v43 = vpop.permute.xlu1 %1448 }
 0x3bd   : > { %v1702_v45 = vpack.c.bf16 %v1446_v39, %v1438_v15  ;;  %v1451_v44 = vpop.permute.xlu0 %1450  ;;  %v1700_v42 = vpack.c.bf16 %v1447_v41, %v1439_v38 }
 0x3be   : > { %v1452_v47 = vsel %vm421_vm6, %v1449_v43, %v1451_v44  ;;  %v1453_v48 = vsel %vm421_vm6, %v1451_v44, %v1449_v43 }
 0x3bf   : > { %v1454_v49 = vmul.f32 %v1452_v47, %v2167_v61  ;;  %v1455_v33 = vmul.f32 %v1453_v48, %v2154_v54  ;;  %1701 = vmatprep.subr.bf16.mxu1 %v1700_v42 }
 0x3c0   : > { %1703 = vmatpush1.bf16.msra.mxu1 %v1702_v45  ;;  %v1457_v32 = vpop.permute.xlu1 %1456 }
 0x3c1   : > { %v1706_v46 = vpack.c.bf16 %v1454_v49, %v2317_v5  ;;  %v1459_v40 = vpop.permute.xlu0 %1458  ;;  %v1704_v50 = vpack.c.bf16 %v1455_v33, %v1415_v6 }
 0x3c2   : > { %v1460_v51 = vsel %vm443_vm7, %v1457_v32, %v1459_v40  ;;  %v1461_v52 = vsel %vm443_vm7, %v1459_v40, %v1457_v32 }
 0x3c3   : > { %1705 = vmatprep.subr.bf16.mxu1 %v1704_v50  ;;  %v1462_v56 = vmul.f32 %v1460_v51, %v2187_v11  ;;  %v1463_v57 = vmul.f32 %v1461_v52, %v2174_v63 }
 0x3c4   : > { %1707 = vmatpush1.bf16.msra.mxu1 %v1706_v46  ;;  %v1465_v53 = vpop.permute.xlu1 %1464 }
 0x3c5   : > { %v1467_v55 = vpop.permute.xlu0 %1466 }
 0x3c6   : > { %v1468_v54 = vsel %vm465_vm8, %v1465_v53, %v1467_v55  ;;  %v1469_v61 = vsel %vm465_vm8, %v1467_v55, %v1465_v53 }
 0x3c7   : > { %v1470_v58 = vmul.f32 %v1468_v54, %v2207_v25  ;;  %v1471_v59 = vmul.f32 %v1469_v61, %v2194_v13  ;;  %v1480_v13 = vld [vmem:[%s2423_s6] sm:$0x3f] }
 0x3c8   : > { %v1473_v60 = vpop.permute.xlu1 %1472 }
 0x3c9   : > { %v1710_v62 = vpack.c.bf16 %v1470_v58, %v1462_v56  ;;  %v1475_v2 = vpop.permute.xlu0 %1474  ;;  %v1708_v3 = vpack.c.bf16 %v1471_v59, %v1463_v57 }
 0x3ca   : > { %v1477_v4 = vsel %vm487_vm9, %v1475_v2, %v1473_v60  ;;  %v1476_v1 = vsel %vm487_vm9, %v1473_v60, %v1475_v2 }
 0x3cb   : > { %v1479_v11 = vmul.f32 %v1477_v4, %v2214_v27  ;;  %1709 = vmatprep.subr.bf16.mxu1 %v1708_v3  ;;  %v1478_v63 = vmul.f32 %v1476_v1, %v2223_v31 }
 0x3cc   : > { %1711 = vmatpush1.bf16.msra.mxu1 %v1710_v62 }
 0x3cd   : > { %1506 = vmatprep.subr.mxu1 %v1479_v11 }
 0x3d0   : > { %1507 = vmatpush1.msra.mxu1 %v1478_v63 }
 0x3d1   : > { %1675 = vmatmul.mubr.msk.f32.vlgmr.msra.gmra.mrb[2].mxu1 %vm1335_vm12, %v1480_v13 }
 0x3d9   : > { %v1485_v25 = vpop.permute.xlu1 %1484 }
 0x4a4   : > { %v1556_v8 = vpop.f32.mrb[2].mxu1 }
 0x4a5   : > { %v1558_v27 = vpop.f32.mrb[3].mxu1  ;;  %v1557_v5 = vadd.f32 %v1556_v8, %v1485_v25 }
 0x4a6   : > { %v1559_v6 = vadd.f32 %v1558_v27, %v1485_v25 }
 0x4a7   : > { %1561 = vst [vmem:[%s323_s26] sm:$0x3f] %v1557_v5 }
 0x4a8   : > { %1562 = vst [vmem:[%s323_s26 + $0x8] sm:$0x3f] %v1559_v6 }
 0x4a9 PF: > { %p18_p8 = scmp.ge.s32.totalorder %s1938_s10, 4   ;;  %s2430_s27 = smov %s1843_s28 }
 0x4aa   : > { %s2431_s28 = smov %s1847_s29  ;;  %s2432_s29 = smov %s1948_s13 }
 0x4ab   : > { %s2433_s30 = smov %s1938_s10  ;;  %20 = sbr.rel (!%p18_p8) target bundleno = 3 (0x3), region = 99 }
 0x4b2   :  { %1584 = vsyncpa [#allocation3], 1 }
 0x4b3   :  { %1586 = vsyncpa [#allocation3 + $0x1], 1 }

</bundles_post_ra>
